<compile_context>
chip_gen: v7x
topology: tpu7x:2x2x1
jax: 0.10.0
libtpu: 0.0.40
codegen_flags: <defaults>
</compile_context>

<pallas_src>
import functools

import jax
import jax.numpy as jnp
from jax import lax
from jax.experimental import pallas as pl
from jax.experimental.pallas import tpu as pltpu


def _recip(x):
    """EUP approximate reciprocal + one Newton-Raphson step (~f32 accuracy)."""
    r = pl.reciprocal(x, approx=True)
    return r * (2.0 - x * r)


def _mcc_consistency_kernel(logits_ref, logits_s_ref, loss_ref, ratio_ref,
                            acc_ref, cnt_ref, *, temperature, thr, batch_size):
    Bt, C = logits_ref.shape
    i = pl.program_id(0)
    n = pl.num_programs(0)

    @pl.when(i == 0)
    def _init():
        acc_ref[...] = jnp.zeros_like(acc_ref)
        cnt_ref[0] = 0.0

    # Valid-row mask for the (possibly padded) tail block.
    row_ids = i * Bt + lax.broadcasted_iota(jnp.int32, (Bt, 1), 0)
    valid = row_ids < batch_size

    inv_t = 1.0 / temperature
    x = jnp.where(valid, logits_ref[...].astype(jnp.float32), 0.0) * inv_t
    xs = jnp.where(valid, logits_s_ref[...].astype(jnp.float32), 0.0) * inv_t

    def softmax_stats(z):
        zs = z - jnp.max(z, axis=-1, keepdims=True)
        e = jnp.exp(zs)
        se = jnp.sum(e, axis=-1, keepdims=True)          # >= 1
        p = e * _recip(se)
        lse = jnp.log(se)
        # entropy via logsumexp identity: -sum(p*log(p)) = lse - sum(p*zs)
        ent = lse - jnp.sum(p * zs, axis=-1, keepdims=True)
        return p, ent

    p, ent_w = softmax_stats(x)       # weak (temperature-scaled) predictions
    ps, ent_s = softmax_stats(xs)     # strong predictions

    # Confidence threshold from the weak predictions (+ valid-row gating).
    max_probs = jnp.max(p, axis=-1, keepdims=True)
    mask = jnp.where(valid & (max_probs >= thr), 1.0, 0.0)   # (Bt, 1)
    cnt_ref[0] += jnp.sum(mask)

    # Raw (un-normalised) entropy weights; the global B / sum(w) rescale of the
    # reference cancels in M / row_sum(M) and is therefore omitted.
    w_w = (1.0 + jnp.exp(-ent_w)) * mask
    w_s = (1.0 + jnp.exp(-ent_s)) * mask

    # Fused MXU push: [pw_w | pw_s]^T @ [p | ps] -> (2C, 2C).
    lhs = jnp.concatenate([p * w_w, ps * w_s], axis=1)   # (Bt, 2C)
    rhs = jnp.concatenate([p, ps], axis=1)               # (Bt, 2C)
    acc_ref[...] += lax.dot_general(lhs, rhs, (((0,), (0,)), ((), ())),
                                    preferred_element_type=jnp.float32)

    @pl.when(i == n - 1)
    def _epilogue():
        A = acc_ref[...]
        Aw = A[:C, :C]        # weak confusion (un-normalised)
        As = A[C:, C:]        # strong confusion (un-normalised)

        def normalize(M):
            # matches torch broadcasting: M[i, j] / sum_k M[j, k]
            row_sum = jnp.maximum(jnp.sum(M, axis=1)[None, :], 1e-30)
            return M * _recip(row_sum)

        Mw = normalize(Aw)
        Ms = normalize(As)
        count = cnt_ref[0]
        # count == 0  =>  accumulators are all zero  =>  loss is exactly 0,
        # reproducing the PyTorch early return (0, 0) without NaN hazards.
        loss = jnp.sum((Mw - Ms) ** 2) * (count * (1.0 / (C * batch_size)))
        loss_ref[0, 0] = loss
        ratio_ref[0, 0] = count * (1.0 / batch_size)


def mcc_consistency(logits, logits_strong, temperature=2.0, thr=0.7,
                    block_rows=256):
    """Pallas TPU implementation of MCCConsistency.forward.

    Returns (consistency_loss, mask_ratio), both scalars.
    """
    assert logits.shape == logits_strong.shape and logits.ndim == 2
    B, C = logits.shape

    if B <= block_rows:
        Bt = B                                 # one block spanning the batch
    else:
        Bt = max(8, (block_rows // 8) * 8)     # sublane-aligned row tile

    pad = (-B) % Bt
    if pad:
        # Pad to a whole number of row blocks; padded rows are masked in-kernel.
        logits = jnp.pad(logits, ((0, pad), (0, 0)))
        logits_strong = jnp.pad(logits_strong, ((0, pad), (0, 0)))
    grid = ((B + pad) // Bt,)

    kernel = functools.partial(_mcc_consistency_kernel,
                               temperature=float(temperature),
                               thr=float(thr), batch_size=B)

    loss, ratio = pl.pallas_call(
        kernel,
        out_shape=(jax.ShapeDtypeStruct((1, 1), jnp.float32),
                   jax.ShapeDtypeStruct((1, 1), jnp.float32)),
        grid_spec=pltpu.PrefetchScalarGridSpec(
            num_scalar_prefetch=0,
            grid=grid,
            in_specs=[pl.BlockSpec((Bt, C), lambda i: (i, 0)),
                      pl.BlockSpec((Bt, C), lambda i: (i, 0))],
            out_specs=(pl.BlockSpec(memory_space=pltpu.MemorySpace.SMEM),
                       pl.BlockSpec(memory_space=pltpu.MemorySpace.SMEM)),
            scratch_shapes=[pltpu.VMEM((2 * C, 2 * C), jnp.float32),
                            pltpu.SMEM((1,), jnp.float32)]),
        compiler_params=pltpu.CompilerParams(
            dimension_semantics=("arbitrary",)),
    )(logits, logits_strong)
    return loss[0, 0], ratio[0, 0]


def mcc_consistency_ref(logits, logits_strong, temperature=2.0, thr=0.7):
    """Pure-JAX reference mirroring the PyTorch module semantics."""
    B, C = logits.shape
    p_thr = jax.nn.softmax(logits / temperature, axis=1)
    max_probs = jnp.max(p_thr, axis=-1)
    mask = (max_probs >= thr).astype(jnp.float32)
    count = jnp.sum(mask)

    def ccm(lg):
        p = jax.nn.softmax(lg / temperature, axis=1)
        ent = -jnp.sum(p * jnp.log(p), axis=1)
        w = (1.0 + jnp.exp(-ent)) * mask
        w = B * w / jnp.sum(w)
        M = (p * w[:, None]).T @ p
        return M / jnp.sum(M, axis=1)

    Mw = ccm(logits)
    Ms = ccm(logits_strong)
    loss = jnp.sum((Mw - Ms) ** 2) / C * count / B
    return jnp.where(count > 0, loss, 0.0), count / B


if __name__ == "__main__":
    temperature, thr = 2.0, 0.7
    root = jax.random.PRNGKey(0)

    def make_inputs(key, B, C):
        k1, k2 = jax.random.split(key)
        logits = 4.0 * jax.random.normal(k1, (B, C), jnp.float32)
        # make the first few rows confidently predicted so the mask is non-empty
        logits = logits.at[: min(4, B), 0].add(20.0)
        logits_strong = logits + jax.random.normal(k2, (B, C), jnp.float32)
        return logits, logits_strong

    configs = [
        dict(B=24, C=16, block_rows=8),    # 3 grid steps, evenly divisible
        dict(B=20, C=16, block_rows=8),    # padded / masked tail block
        dict(B=8, C=16, block_rows=256),   # single full-batch block
    ]
    keys = jax.random.split(root, len(configs))
    for cfg, k in zip(configs, keys):
        logits, logits_strong = make_inputs(k, cfg["B"], cfg["C"])
        loss, ratio = mcc_consistency(logits, logits_strong, temperature, thr,
                                      block_rows=cfg["block_rows"])
        loss, ratio = jax.block_until_ready((loss, ratio))
        loss_ref, ratio_ref = mcc_consistency_ref(logits, logits_strong,
                                                  temperature, thr)
        assert jnp.allclose(ratio, ratio_ref, rtol=0, atol=1e-6), \
            (cfg, ratio, ratio_ref)
        assert jnp.allclose(loss, loss_ref, rtol=2e-3, atol=1e-6), \
            (cfg, loss, loss_ref)
    print("KERNEL_OK")
</pallas_src>

<mosaic_0001>
module attributes {stable_mosaic.version = 11 : i64} {
  func.func @_mcc_consistency_kernel(%arg0: i32, %arg1: memref<8x16xf32, #tpu.memory_space<vmem>>, %arg2: memref<8x16xf32, #tpu.memory_space<vmem>>, %arg3: memref<1x1xf32, #tpu.memory_space<smem>>, %arg4: memref<1x1xf32, #tpu.memory_space<smem>>, %arg5: memref<32x32xf32, #tpu.memory_space<vmem>>, %arg6: memref<1xf32, #tpu.memory_space<smem>>) attributes {dimension_semantics = [#tpu.dimension_semantics<arbitrary>], iteration_bounds = array<i64: 3>, scalar_prefetch = 0 : i64, scratch_operands = 2 : i64, tpu.core_type = #tpu.core_type<tc>, window_params = [{transform_indices = @transform_0, window_bounds = array<i64: 8, 16>}, {transform_indices = @transform_1, window_bounds = array<i64: 8, 16>}, {transform_indices = @transform_2, window_bounds = array<i64: 1, 1>}, {transform_indices = @transform_3, window_bounds = array<i64: 1, 1>}]} {
    %c0_i32 = arith.constant 0 : i32
    %0 = arith.cmpi eq, %arg0, %c0_i32 : i32
    %1 = arith.extui %0 : i1 to i32
    %c0_i32_0 = arith.constant 0 : i32
    %2 = arith.cmpi ne, %1, %c0_i32_0 : i32
    scf.if %2 {
      %cst_32 = arith.constant 0.000000e+00 : f32
      %101 = vector.broadcast %cst_32 : f32 to vector<32x32xf32>
      %c0_33 = arith.constant 0 : index
      %c0_34 = arith.constant 0 : index
      %102 = vector.load %arg5[%c0_33, %c0_34] : memref<32x32xf32, #tpu.memory_space<vmem>>, vector<32x32xf32>
      tpu.vector_store %arg5[%c0_33, %c0_34], %101 {strides = array<i32>} : memref<32x32xf32, #tpu.memory_space<vmem>>, vector<32x32xf32>,
      %cst_35 = arith.constant 0.000000e+00 : f32
      %c0_36 = arith.constant 0 : index
      %103 = memref.load %arg6[%c0_36] : memref<1xf32, #tpu.memory_space<smem>>
      memref.store %cst_35, %arg6[%c0_36] : memref<1xf32, #tpu.memory_space<smem>>
    } else {
    }
    %c8_i32 = arith.constant 8 : i32
    %3 = arith.muli %arg0, %c8_i32 : i32
    %4 = tpu.iota {dimensions = array<i32: 0>} : vector<8x1xi32>
    %5 = vector.broadcast %3 : i32 to vector<8x1xi32>
    %6 = arith.addi %5, %4 : vector<8x1xi32>
    %c24_i32 = arith.constant 24 : i32
    %7 = vector.broadcast %c24_i32 : i32 to vector<8x1xi32>
    %8 = arith.cmpi slt, %6, %7 : vector<8x1xi32>
    %c0 = arith.constant 0 : index
    %c0_1 = arith.constant 0 : index
    %9 = vector.load %arg1[%c0, %c0_1] : memref<8x16xf32, #tpu.memory_space<vmem>>, vector<8x16xf32>
    %cst = arith.constant 0.000000e+00 : f32
    %10 = vector.shape_cast %8 : vector<8x1xi1> to vector<8x1xi1>
    %11 = vector.broadcast %10 : vector<8x1xi1> to vector<8x16xi1>
    %12 = vector.broadcast %cst : f32 to vector<8x16xf32>
    %13 = arith.select %11, %9, %12 : vector<8x16xi1>, vector<8x16xf32>
    %cst_2 = arith.constant 5.000000e-01 : f32
    %14 = vector.broadcast %cst_2 : f32 to vector<8x16xf32>
    %15 = arith.mulf %13, %14 : vector<8x16xf32>
    %c0_3 = arith.constant 0 : index
    %c0_4 = arith.constant 0 : index
    %16 = vector.load %arg2[%c0_3, %c0_4] : memref<8x16xf32, #tpu.memory_space<vmem>>, vector<8x16xf32>
    %cst_5 = arith.constant 0.000000e+00 : f32
    %17 = vector.shape_cast %8 : vector<8x1xi1> to vector<8x1xi1>
    %18 = vector.broadcast %17 : vector<8x1xi1> to vector<8x16xi1>
    %19 = vector.broadcast %cst_5 : f32 to vector<8x16xf32>
    %20 = arith.select %18, %16, %19 : vector<8x16xi1>, vector<8x16xf32>
    %cst_6 = arith.constant 5.000000e-01 : f32
    %21 = vector.broadcast %cst_6 : f32 to vector<8x16xf32>
    %22 = arith.mulf %20, %21 : vector<8x16xf32>
    %cst_7 = arith.constant dense<0xFF800000> : vector<8xf32>
    %23 = vector.multi_reduction <maximumf>, %15, %cst_7 [1] : vector<8x16xf32> to vector<8xf32>
    %24 = vector.shape_cast %23 : vector<8xf32> to vector<8x1xf32>
    %25 = vector.broadcast %24 : vector<8x1xf32> to vector<8x16xf32>
    %26 = arith.subf %15, %25 : vector<8x16xf32>
    %27 = math.exp %26 : vector<8x16xf32>
    %cst_8 = arith.constant dense<0.000000e+00> : vector<8xf32>
    %28 = vector.multi_reduction <add>, %27, %cst_8 [1] : vector<8x16xf32> to vector<8xf32>
    %29 = vector.shape_cast %28 : vector<8xf32> to vector<8x1xf32>
    %30 = tpu.reciprocal %29 {approx = true} : vector<8x1xf32> -> vector<8x1xf32>
    %31 = arith.mulf %29, %30 : vector<8x1xf32>
    %cst_9 = arith.constant 2.000000e+00 : f32
    %32 = vector.broadcast %cst_9 : f32 to vector<8x1xf32>
    %33 = arith.subf %32, %31 : vector<8x1xf32>
    %34 = arith.mulf %30, %33 : vector<8x1xf32>
    %35 = vector.broadcast %34 : vector<8x1xf32> to vector<8x16xf32>
    %36 = arith.mulf %27, %35 : vector<8x16xf32>
    %37 = math.log %29 : vector<8x1xf32>
    %38 = arith.mulf %36, %26 : vector<8x16xf32>
    %cst_10 = arith.constant dense<0.000000e+00> : vector<8xf32>
    %39 = vector.multi_reduction <add>, %38, %cst_10 [1] : vector<8x16xf32> to vector<8xf32>
    %40 = vector.shape_cast %39 : vector<8xf32> to vector<8x1xf32>
    %41 = arith.subf %37, %40 : vector<8x1xf32>
    %cst_11 = arith.constant dense<0xFF800000> : vector<8xf32>
    %42 = vector.multi_reduction <maximumf>, %22, %cst_11 [1] : vector<8x16xf32> to vector<8xf32>
    %43 = vector.shape_cast %42 : vector<8xf32> to vector<8x1xf32>
    %44 = vector.broadcast %43 : vector<8x1xf32> to vector<8x16xf32>
    %45 = arith.subf %22, %44 : vector<8x16xf32>
    %46 = math.exp %45 : vector<8x16xf32>
    %cst_12 = arith.constant dense<0.000000e+00> : vector<8xf32>
    %47 = vector.multi_reduction <add>, %46, %cst_12 [1] : vector<8x16xf32> to vector<8xf32>
    %48 = vector.shape_cast %47 : vector<8xf32> to vector<8x1xf32>
    %49 = tpu.reciprocal %48 {approx = true} : vector<8x1xf32> -> vector<8x1xf32>
    %50 = arith.mulf %48, %49 : vector<8x1xf32>
    %cst_13 = arith.constant 2.000000e+00 : f32
    %51 = vector.broadcast %cst_13 : f32 to vector<8x1xf32>
    %52 = arith.subf %51, %50 : vector<8x1xf32>
    %53 = arith.mulf %49, %52 : vector<8x1xf32>
    %54 = vector.broadcast %53 : vector<8x1xf32> to vector<8x16xf32>
    %55 = arith.mulf %46, %54 : vector<8x16xf32>
    %56 = math.log %48 : vector<8x1xf32>
    %57 = arith.mulf %55, %45 : vector<8x16xf32>
    %cst_14 = arith.constant dense<0.000000e+00> : vector<8xf32>
    %58 = vector.multi_reduction <add>, %57, %cst_14 [1] : vector<8x16xf32> to vector<8xf32>
    %59 = vector.shape_cast %58 : vector<8xf32> to vector<8x1xf32>
    %60 = arith.subf %56, %59 : vector<8x1xf32>
    %cst_15 = arith.constant dense<0xFF800000> : vector<8xf32>
    %61 = vector.multi_reduction <maximumf>, %36, %cst_15 [1] : vector<8x16xf32> to vector<8xf32>
    %62 = vector.shape_cast %61 : vector<8xf32> to vector<8x1xf32>
    %cst_16 = arith.constant 0.699999988 : f32
    %63 = vector.broadcast %cst_16 : f32 to vector<8x1xf32>
    %64 = arith.cmpf oge, %62, %63 : vector<8x1xf32>
    %65 = arith.andi %8, %64 : vector<8x1xi1>
    %cst_17 = arith.constant 1.000000e+00 : f32
    %cst_18 = arith.constant 0.000000e+00 : f32
    %66 = vector.broadcast %cst_17 : f32 to vector<8x1xf32>
    %67 = vector.broadcast %cst_18 : f32 to vector<8x1xf32>
    %68 = arith.select %65, %66, %67 : vector<8x1xi1>, vector<8x1xf32>
    %c0_19 = arith.constant 0 : index
    %69 = memref.load %arg6[%c0_19] : memref<1xf32, #tpu.memory_space<smem>>
    %70 = vector.shape_cast %68 : vector<8x1xf32> to vector<1x8x1xf32>
    %cst_20 = arith.constant dense<0.000000e+00> : vector<1xf32>
    %71 = vector.multi_reduction <add>, %70, %cst_20 [1, 2] : vector<1x8x1xf32> to vector<1xf32>
    %72 = vector.shape_cast %71 : vector<1xf32> to vector<1x1x1xf32>
    %73 = vector.extract %72[0, 0, 0] : f32 from vector<1x1x1xf32>
    %74 = arith.addf %69, %73 : f32
    %c0_21 = arith.constant 0 : index
    %75 = memref.load %arg6[%c0_21] : memref<1xf32, #tpu.memory_space<smem>>
    memref.store %74, %arg6[%c0_21] : memref<1xf32, #tpu.memory_space<smem>>
    %cst_22 = arith.constant 0.000000e+00 : f32
    %76 = vector.broadcast %cst_22 : f32 to vector<8x1xf32>
    %77 = arith.subf %76, %41 : vector<8x1xf32>
    %78 = math.exp %77 : vector<8x1xf32>
    %cst_23 = arith.constant 1.000000e+00 : f32
    %79 = vector.broadcast %cst_23 : f32 to vector<8x1xf32>
    %80 = arith.addf %79, %78 : vector<8x1xf32>
    %81 = arith.mulf %80, %68 : vector<8x1xf32>
    %cst_24 = arith.constant 0.000000e+00 : f32
    %82 = vector.broadcast %cst_24 : f32 to vector<8x1xf32>
    %83 = arith.subf %82, %60 : vector<8x1xf32>
    %84 = math.exp %83 : vector<8x1xf32>
    %cst_25 = arith.constant 1.000000e+00 : f32
    %85 = vector.broadcast %cst_25 : f32 to vector<8x1xf32>
    %86 = arith.addf %85, %84 : vector<8x1xf32>
    %87 = arith.mulf %86, %68 : vector<8x1xf32>
    %88 = vector.broadcast %81 : vector<8x1xf32> to vector<8x16xf32>
    %89 = arith.mulf %36, %88 : vector<8x16xf32>
    %90 = vector.broadcast %87 : vector<8x1xf32> to vector<8x16xf32>
    %91 = arith.mulf %55, %90 : vector<8x16xf32>
    %92 = tpu.concatenate %89, %91 in 1 : vector<8x16xf32>, vector<8x16xf32> -> vector<8x32xf32>
    %93 = tpu.concatenate %36, %55 in 1 : vector<8x16xf32>, vector<8x16xf32> -> vector<8x32xf32>
    %c0_26 = arith.constant 0 : index
    %c0_27 = arith.constant 0 : index
    %94 = vector.load %arg5[%c0_26, %c0_27] : memref<32x32xf32, #tpu.memory_space<vmem>>, vector<32x32xf32>
    %cst_28 = arith.constant dense<0.000000e+00> : vector<32x32xf32>
    %95 = tpu.matmul %92, %93, %cst_28 {dimension_numbers = #tpu.dot_dimension_numbers<[0], [0], [1], [1], [0, 1, 1, 1], [], []>} : vector<8x32xf32>, vector<8x32xf32>, vector<32x32xf32> -> vector<32x32xf32>
    %96 = arith.addf %94, %95 : vector<32x32xf32>
    %c0_29 = arith.constant 0 : index
    %c0_30 = arith.constant 0 : index
    %97 = vector.load %arg5[%c0_29, %c0_30] : memref<32x32xf32, #tpu.memory_space<vmem>>, vector<32x32xf32>
    tpu.vector_store %arg5[%c0_29, %c0_30], %96 {strides = array<i32>} : memref<32x32xf32, #tpu.memory_space<vmem>>, vector<32x32xf32>,
    %c2_i32 = arith.constant 2 : i32
    %98 = arith.cmpi eq, %arg0, %c2_i32 : i32
    %99 = arith.extui %98 : i1 to i32
    %c0_i32_31 = arith.constant 0 : i32
    %100 = arith.cmpi ne, %99, %c0_i32_31 : i32
    scf.if %100 {
      %c0_32 = arith.constant 0 : index
      %c0_33 = arith.constant 0 : index
      %101 = vector.load %arg5[%c0_32, %c0_33] : memref<32x32xf32, #tpu.memory_space<vmem>>, vector<32x32xf32>
      %102 = vector.extract_strided_slice %101 {offsets = [0, 0], sizes = [16, 16], strides = [1, 1]} : vector<32x32xf32> to vector<16x16xf32>
      %103 = vector.extract_strided_slice %101 {offsets = [16, 16], sizes = [16, 16], strides = [1, 1]} : vector<32x32xf32> to vector<16x16xf32>
      %cst_34 = arith.constant dense<0.000000e+00> : vector<16xf32>
      %104 = vector.multi_reduction <add>, %102, %cst_34 [1] : vector<16x16xf32> to vector<16xf32>
      %105 = vector.shape_cast %104 : vector<16xf32> to vector<1x16xf32>
      %cst_35 = arith.constant 1.000000e-30 : f32
      %106 = vector.broadcast %cst_35 : f32 to vector<1x16xf32>
      %107 = arith.maximumf %105, %106 : vector<1x16xf32>
      %108 = tpu.reciprocal %107 {approx = true} : vector<1x16xf32> -> vector<1x16xf32>
      %109 = arith.mulf %107, %108 : vector<1x16xf32>
      %cst_36 = arith.constant 2.000000e+00 : f32
      %110 = vector.broadcast %cst_36 : f32 to vector<1x16xf32>
      %111 = arith.subf %110, %109 : vector<1x16xf32>
      %112 = arith.mulf %108, %111 : vector<1x16xf32>
      %113 = vector.broadcast %112 : vector<1x16xf32> to vector<16x16xf32>
      %114 = arith.mulf %102, %113 : vector<16x16xf32>
      %cst_37 = arith.constant dense<0.000000e+00> : vector<16xf32>
      %115 = vector.multi_reduction <add>, %103, %cst_37 [1] : vector<16x16xf32> to vector<16xf32>
      %116 = vector.shape_cast %115 : vector<16xf32> to vector<1x16xf32>
      %cst_38 = arith.constant 1.000000e-30 : f32
      %117 = vector.broadcast %cst_38 : f32 to vector<1x16xf32>
      %118 = arith.maximumf %116, %117 : vector<1x16xf32>
      %119 = tpu.reciprocal %118 {approx = true} : vector<1x16xf32> -> vector<1x16xf32>
      %120 = arith.mulf %118, %119 : vector<1x16xf32>
      %cst_39 = arith.constant 2.000000e+00 : f32
      %121 = vector.broadcast %cst_39 : f32 to vector<1x16xf32>
      %122 = arith.subf %121, %120 : vector<1x16xf32>
      %123 = arith.mulf %119, %122 : vector<1x16xf32>
      %124 = vector.broadcast %123 : vector<1x16xf32> to vector<16x16xf32>
      %125 = arith.mulf %103, %124 : vector<16x16xf32>
      %c0_40 = arith.constant 0 : index
      %126 = memref.load %arg6[%c0_40] : memref<1xf32, #tpu.memory_space<smem>>
      %127 = arith.subf %114, %125 : vector<16x16xf32>
      %128 = arith.mulf %127, %127 : vector<16x16xf32>
      %129 = vector.shape_cast %128 : vector<16x16xf32> to vector<1x16x16xf32>
      %cst_41 = arith.constant dense<0.000000e+00> : vector<1xf32>
      %130 = vector.multi_reduction <add>, %129, %cst_41 [1, 2] : vector<1x16x16xf32> to vector<1xf32>
      %131 = vector.shape_cast %130 : vector<1xf32> to vector<1x1x1xf32>
      %132 = vector.extract %131[0, 0, 0] : f32 from vector<1x1x1xf32>
      %cst_42 = arith.constant 0.00260416674 : f32
      %133 = arith.mulf %126, %cst_42 : f32
      %134 = arith.mulf %132, %133 : f32
      %c0_43 = arith.constant 0 : index
      %c0_44 = arith.constant 0 : index
      %135 = memref.load %arg3[%c0_43, %c0_44] : memref<1x1xf32, #tpu.memory_space<smem>>
      memref.store %134, %arg3[%c0_43, %c0_44] : memref<1x1xf32, #tpu.memory_space<smem>>
      %cst_45 = arith.constant 0.0416666679 : f32
      %136 = arith.mulf %126, %cst_45 : f32
      %c0_46 = arith.constant 0 : index
      %c0_47 = arith.constant 0 : index
      %137 = memref.load %arg4[%c0_46, %c0_47] : memref<1x1xf32, #tpu.memory_space<smem>>
      memref.store %136, %arg4[%c0_46, %c0_47] : memref<1x1xf32, #tpu.memory_space<smem>>
    } else {
    }
    return
  }
  func.func @transform_0(%arg0: i32) -> (i32, i32) {
    %c0_i32 = arith.constant 0 : i32
    %c0_i32_0 = arith.constant 0 : i32
    return %arg0, %c0_i32 : i32, i32
  }
  func.func @transform_1(%arg0: i32) -> (i32, i32) {
    %c0_i32 = arith.constant 0 : i32
    %c0_i32_0 = arith.constant 0 : i32
    return %arg0, %c0_i32 : i32, i32
  }
  func.func @transform_2(%arg0: i32) -> (i32, i32) {
    %c0_i32 = arith.constant 0 : i32
    %c0_i32_0 = arith.constant 0 : i32
    %c0_i32_1 = arith.constant 0 : i32
    return %c0_i32, %c0_i32_0 : i32, i32
  }
  func.func @transform_3(%arg0: i32) -> (i32, i32) {
    %c0_i32 = arith.constant 0 : i32
    %c0_i32_0 = arith.constant 0 : i32
    %c0_i32_1 = arith.constant 0 : i32
    return %c0_i32, %c0_i32_0 : i32, i32
  }
}

</mosaic_0001>

<bundles_post_ra>
// kernel: tpu_custom_call.1
= control target key start
LH: loop header
LB: loop body
LE: loop exit
PB: predicated region body
PF: predicated region fallthrough
CT: control target
= control target key end

     0   :  { %9 = vsyncpa [#allocation5], 0  ;;  %s894_s0 = inlined_call_operand.vmem [shape: f32[24,16], index: 0, kind: input, shape index: {}]   ;;  %s895_s1 = inlined_call_operand.vmem [shape: f32[24,16], index: 1, kind: input, shape index: {}]   ;;  %s896_s2 = inlined_call_operand.hbm [shape: f32[1,1], index: 2, kind: output, shape index: {0}]   ;;  %s897_s3 = inlined_call_operand.hbm [shape: f32[1,1], index: 3, kind: output, shape index: {1}]  }
   0x1   :  { %10 = vsyncpa [#allocation7], 0  ;;  %s790_s12 = smov 0  }
   0x2 LB: > { %s796_s13 = sadd.s32 4294967295, %s761_s12   ;;  %p637_p0 = scmp.ge.s32.totalorder %s761_s12, 1  ;;  %s761_s12 = sphi %s790_s12, %s16_s12  }
   0x3   : > { %p140_p1 = scmp.lt.s32.totalorder %s761_s12, 4 }
   0x5   : > { %p141_p2 = pnand %p637_p0, %p140_p1 }
   0x6   : > { %p162_p3 = scmp.lt.s32.totalorder (!%p141_p2), %s796_s13, 2  ;;  %p640_p4 = scmp.ne.s32.totalorder (!%p141_p2), %s796_s13, 0 }
   0x7   : > { %144 = sbr.rel (%p141_p2) target bundleno = 1647 (0x66f), region = 28 }
   0xe   : > { %s163_s14 = scalar_select %p162_p3, %s796_s13, 2 }
   0xf   : > { %173 = sbr.rel (%p640_p4) target bundleno = 22 (0x16), region = 32  ;;  %vm174_vm0 = vcmask (!%p640_p4), 261120   ;;  %v763_v0 = vmov (!%p640_p4), 0.0   ;;  %s764_s22 = smov (!%p640_p4), 0.0  }
  0x10   : > { %s638_s15 = sshll.u32 %s163_s14, 3  ;;  %175 = vst.msk [vmem:[#allocation2] sm:$0xff] (!%p640_p4), %vm174_vm0, %v763_v0  ;;  %176 = vst.msk [vmem:[#allocation2 + $0x8] sm:$0xff] (!%p640_p4), %vm174_vm0, %v763_v0  ;;  %180 = sst [smem:[#allocation3]] (!%p640_p4), %s764_s22 }
  0x11   : > { %s165_s18 = scalar_lea.vmem %s894_s0, %s638_s15  ;;  %s169_s21 = scalar_lea.vmem %s895_s1, %s638_s15  ;;  %177 = vst.msk [vmem:[#allocation2 + $0x10] sm:$0xff] (!%p640_p4), %vm174_vm0, %v763_v0  ;;  %178 = vst.msk [vmem:[#allocation2 + $0x18] sm:$0xff] (!%p640_p4), %vm174_vm0, %v763_v0 }
  0x16 PF: > { %s641_s23 = sshll.u32 %s796_s13, 3  ;;  %v182_v1 = vlaneseq  ;;  %v192_v5 = vld [vmem:[%s169_s21] sm:$0xff]  ;;  %vm195_vm2 = vcmask 130048   ;;  %s765_s24 = smov 16   ;;  %vm245_vm4 = vcmask 7168   ;;  %v766_v50 = vmov 0.0  }
  0x17   : > { %v184_v2 = vstv %s641_s23  ;;  %v187_v6 = vld [vmem:[%s165_s18] sm:$0xff]  ;;  %s244_s25 = sld [smem:[#allocation3]]  ;;  %vm317_vm6 = vcmask 64512   ;;  %vm419_vm7 = vcmask 261120   ;;  %p646_p5 = scmp.ne.s32.totalorder %s796_s13, 2 }
  0x18   : > { %v811_v3 = vshrl.u32 %v182_v1, 7  ;;  %s767_s28 = smov (!%p646_p5), 112   ;;  %vm514_vm8 = vcmask (!%p646_p5), 261312   ;;  %vm461_vm9 = vcmask (!%p646_p5), 130112  }
  0x1a   : > { %v814_v4 = vadd.s32 %v184_v2, %v811_v3 }
  0x1c   : > { %vm186_vm1 = vcmp.lt.s32.totalorder %v814_v4, 24 }
  0x1d   : > { %v193_v7 = vsel %vm186_vm1, %v192_v5, 0.0  ;;  %v190_v8 = vsel %vm186_vm1, %v187_v6, 0.0 }
  0x1e   : > { %v194_v9 = vmul.f32 0.5, %v193_v7  ;;  %v191_v10 = vmul.f32 0.5, %v190_v8 }
  0x20   : > { %v217_v11 = vsel %vm195_vm2, %v194_v9, -inf  ;;  %v196_v12 = vsel %vm195_vm2, %v191_v10, -inf }
  0x21   : > { %218 = vmax.xlane.f32.xlu0 %v217_v11 }
  0x25   : > { %197 = vmax.xlane.f32.xlu0 %v196_v12 }
  0xae   : > { %v219_v13 = vpop.xlane.xlu0 %218 }
  0xaf   : > { %v220_v14 = vsub.f32 %v194_v9, %v219_v13 }
  0xb1   : > { %v221_v15 = vmul.f32 1.442695, %v220_v14 }
  0xb2   : > { %v198_v16 = vpop.xlane.xlu0 %197 }
  0xb3   : > { %699 = vpow2.f32 %v221_v15  ;;  %v199_v17 = vsub.f32 %v191_v10, %v198_v16 }
  0xb5   : > { %v200_v18 = vmul.f32 1.442695, %v199_v17 }
  0xb7   : > { %701 = vpow2.f32 %v200_v18  ;;  %v281_v18 = vld [vmem:[#allocation2] sm:$0xff] }
  0xbd   : > { %v700_v19 = vpop.eup %699 }
  0xbe   : > { %v223_v20 = vsel %vm195_vm2, %v700_v19, 0.0 }
  0xbf   : > { %224 = vadd.xlane.f32.xlu1 %v223_v20 }
  0xc1   : > { %v702_v21 = vpop.eup %701 }
  0xc2   : > { %v202_v22 = vsel %vm195_vm2, %v702_v21, 0.0 }
  0xc3   : > { %203 = vadd.xlane.f32.xlu1 %v202_v22 }
 0x14c   : > { %v225_v23 = vpop.xlane.xlu1 %224 }
 0x14d   : > { %703 = vrcp.f32 %v225_v23 }
 0x150   : > { %v204_v24 = vpop.xlane.xlu1 %203 }
 0x151   : > { %705 = vrcp.f32 %v204_v24 }
 0x152   : > { %707 = vlog2.f32 %v225_v23 }
 0x153   : > { %709 = vlog2.f32 %v204_v24 }
 0x157   : > { %v704_v25 = vpop.eup %703 }
 0x158   : > { %v227_v26 = vmul.f32 %v704_v25, %v225_v23  ;;  %v284_v23 = vld [vmem:[#allocation2 + $0x18] sm:$0xff] }
 0x15a   : > { %v228_v27 = vsub.f32 2.0, %v227_v26 }
 0x15b   : > { %v706_v28 = vpop.eup %705 }
 0x15c   : > { %v229_v29 = vmul.f32 %v704_v25, %v228_v27  ;;  %v206_v30 = vmul.f32 %v706_v28, %v204_v24  ;;  %v708_v40 = vpop.eup %707  ;;  %v283_v24 = vld [vmem:[#allocation2 + $0x10] sm:$0xff] }
 0x15d   : > { %v232_v41 = vmul.f32 0.6931472, %v708_v40  ;;  %v710_v42 = vpop.eup %709 }
 0x15e   : > { %v207_v31 = vsub.f32 2.0, %v206_v30  ;;  %v230_v32 = vmul.f32 %v700_v19, %v229_v29  ;;  %v211_v47 = vmul.f32 0.6931472, %v710_v42 }
 0x160   : > { %v208_v33 = vmul.f32 %v706_v28, %v207_v31  ;;  %v233_v34 = vmul.f32 %v230_v32, %v220_v14 }
 0x162   : > { %v209_v35 = vmul.f32 %v702_v21, %v208_v33  ;;  %v234_v36 = vsel %vm195_vm2, %v233_v34, 0.0 }
 0x163   : > { %235 = vadd.xlane.f32.xlu0 %v234_v36 }
 0x164   : > { %v238_v37 = vsel %vm195_vm2, %v209_v35, -inf  ;;  %v212_v38 = vmul.f32 %v209_v35, %v199_v17  ;;  %v282_v17 = vld [vmem:[#allocation2 + $0x8] sm:$0xff] }
 0x165   : > { %239 = vmax.xlane.f32.xlu1 %v238_v37 }
 0x166   : > { %v213_v39 = vsel %vm195_vm2, %v212_v38, 0.0 }
 0x167   : > { %214 = vadd.xlane.f32.xlu0 %v213_v39 }
 0x17d   : > { %277 = vrot.lane.b32.xlu0 %v230_v32, %s765_s24 }
 0x1f0   : > { %v236_v43 = vpop.xlane.xlu0 %235 }
 0x1f1   : > { %v237_v44 = vsub.f32 %v232_v41, %v236_v43  ;;  %v451_v43 = vand.u32 (!%p646_p5), 127, %v182_v1 }
 0x1f2   : > { %v240_v45 = vpop.xlane.xlu1 %239 }
 0x1f3   : > { %v264_v46 = vsub.f32 0.0, %v237_v44  ;;  %vm241_vm3 = vcmp.ge.f32.partialorder %v240_v45, 0.7 }
 0x1f4   : > { %vm242_vm5 = vmand %vm186_vm1, %vm241_vm3  ;;  %v215_v48 = vpop.xlane.xlu0 %214 }
 0x1f5   : > { %v265_v49 = vmul.f32 1.442695, %v264_v46  ;;  %v243_v51 = vsel %vm242_vm5, 1.0, %v766_v50  ;;  %v216_v52 = vsub.f32 %v211_v47, %v215_v48  ;;  %v504_v46 = vadd.s32 (!%p646_p5), 4294967280, %v451_v43 }
 0x1f6   : > { %v246_v53 = vsel %vm245_vm4, %v243_v51, 0.0  ;;  %v509_v48 = vadd.s32 (!%p646_p5), 4294967272, %v451_v43 }
 0x1f7   : > { %711 = vpow2.f32 %v265_v49  ;;  %v259_v54 = vsub.f32 0.0, %v216_v52  ;;  %247 = vadd.xlane.f32.xlu0 %v246_v53 }
 0x1f8   : > { %v278_v55 = vpop.permute.xlu0 %277  ;;  %v512_v53 = vsub.s32 (!%p646_p5), %v509_v48, %v811_v3 }
 0x1f9   : > { %v260_v56 = vmul.f32 1.442695, %v259_v54  ;;  %v280_v57 = vsel %vm195_vm2, %v209_v35, %v278_v55 }
 0x1fa   : > { %658 = vmatprep.subr.mxu0 %v280_v57  ;;  %666 = vmatprep.subr.mxu1 %v280_v57 }
 0x1fb   : > { %713 = vpow2.f32 %v260_v56  ;;  %659 = vmatpush3.msra.mxu0 %v280_v57  ;;  %667 = vmatpush3.msra.mxu1 %v280_v57 }
 0x201   : > { %v712_v58 = vpop.eup %711 }
 0x202   : > { %v267_v59 = vadd.f32 1.0, %v712_v58 }
 0x204   : > { %v268_v60 = vmul.f32 %v267_v59, %v243_v51 }
 0x205   : > { %v714_v61 = vpop.eup %713 }
 0x206   : > { %v262_v62 = vadd.f32 1.0, %v714_v61  ;;  %v270_v63 = vmul.f32 %v268_v60, %v230_v32 }
 0x208   : > { %v263_v0 = vmul.f32 %v262_v62, %v243_v51  ;;  %272 = vrot.lane.b32.xlu1 %v270_v63, %s765_s24  ;;  %v507_v51 = vsub.s32 (!%p646_p5), %v504_v46, %v811_v3 }
 0x20a   : > { %v269_v2 = vmul.f32 %v263_v0, %v209_v35 }
 0x27a   : > { %v273_v4 = vpop.permute.xlu1 %272 }
 0x27b   : > { %v275_v5 = vsel %vm195_vm2, %v269_v2, %v273_v4 }
 0x27c   : > { %285 = vxpose.xlu1.b32.start.end [1/1] (short) (narrow) %v275_v5, 32 }
 0x284   : > { %v248_v6 = vpop.xlane.xlu0 %247 }
 0x285   : > { %v249_v7 = vrot.slane %v248_v6, 4 }
 0x287   : > { %v250_v8 = vadd.f32 %v249_v7, %v248_v6  ;;  %v456_v6 = vadd.s32 (!%p646_p5), 4294967288, %v451_v43 }
 0x289   : > { %v251_v9 = vrot.slane %v250_v8, 2 }
 0x28b   : > { %v252_v10 = vadd.f32 %v251_v9, %v250_v8  ;;  %v459_v9 = vsub.s32 (!%p646_p5), %v456_v6, %v811_v3 }
 0x28d   : > { %v253_v11 = vrot.slane %v252_v10, 1 }
 0x28f   : > { %v254_v12 = vadd.f32 %v253_v11, %v252_v10  ;;  %v454_v11 = vsub.s32 (!%p646_p5), %v451_v43, %v811_v3 }
 0x291   : > { %668 = vpush %v254_v12 }
 0x2c2   : > { %s669_s26 = spop %668 }
 0x2c3   : > { %s256_s27 = sadd.f32 %s669_s26, %s244_s25 }
 0x2c5   : > { %258 = sst [smem:[#allocation3]] %s256_s27 }
 0x2c6   : > { %s525_s29 = sld [smem:[#allocation3]] (!%p646_p5) }
 0x2cc   : > { %s554_s30 = smul.f32 (!%p646_p5), 0.041666668, %s525_s29 }
 0x2cd   : > { %s550_s4 = smul.f32 (!%p646_p5), 0.0026041667, %s525_s29 }
 0x2ce   : > { %556 = sst [smem:[#allocation6]] (!%p646_p5), %s554_s30 }
 0x2fc   : > { %v301_v13 = vpop.trf.xlu1 }
 0x2fd   : > { %660 = vmatprep.mubr.msk.f32.mxu0 %vm317_vm6, %v301_v13 }
 0x300   : > { %v302_v14 = vpop.trf.xlu1 }
 0x301   : > { %661 = vmatmul.mubr.msk.f32.vlgmr.msra.gmra.mrb[0].mxu0 %vm317_vm6, %v302_v14 }
 0x304   : > { %v303_v15 = vpop.trf.xlu1 }
 0x305   : > { %663 = vmatprep.mubr.msk.f32.mxu1 %vm317_vm6, %v303_v15 }
 0x308   : > { %v304_v16 = vpop.trf.xlu1 }
 0x309   : > { %664 = vmatmul.mubr.msk.f32.vlgmr.msra.gmra.mrb[0].mxu1 %vm317_vm6, %v304_v16 }
 0x3d4   : > { %v662_v19 = vpop.f32.mrb[0].mxu0 }
 0x3d5   : > { %v416_v20 = vadd.f32 %v662_v19, %v282_v17  ;;  %v396_v21 = vpop.f32.mrb[1].mxu0 }
 0x3d6   : > { %v415_v22 = vadd.f32 %v396_v21, %v281_v18 }
 0x3d7   : > { %421 = vst.msk [vmem:[#allocation2 + $0x8] sm:$0xff] %vm419_vm7, %v416_v20 }
 0x3d8   : > { %420 = vst.msk [vmem:[#allocation2] sm:$0xff] %vm419_vm7, %v415_v22 }
 0x3da   : > { %427 = sbr.rel (%p646_p5) target bundleno = 1619 (0x653), region = 36 }
 0x3dc   : > { %v665_v25 = vpop.f32.mrb[0].mxu1 }
 0x3dd   : > { %v418_v26 = vadd.f32 %v665_v25, %v284_v23  ;;  %v406_v27 = vpop.f32.mrb[1].mxu1 }
 0x3de   : > { %v417_v28 = vadd.f32 %v406_v27, %v283_v24  ;;  %v429_v36 = vld [vmem:[#allocation2 + $0x8] sm:$0xff] (!%p646_p5) }
 0x3df   : > { %423 = vst.msk [vmem:[#allocation2 + $0x18] sm:$0xff] %vm419_vm7, %v418_v26  ;;  %v428_v31 = vld [vmem:[#allocation2] sm:$0xff] (!%p646_p5)  ;;  %v435_v38 = vsel (!%p646_p5), %vm195_vm2, %v429_v36, 0.0 }
 0x3e0   : > { %422 = vst.msk [vmem:[#allocation2 + $0x10] sm:$0xff] %vm419_vm7, %v417_v28  ;;  %v432_v32 = vsel (!%p646_p5), %vm195_vm2, %v428_v31, 0.0 }
 0x3e6   : > { %v431_v30 = vld [vmem:[#allocation2 + $0x18] sm:$0xff] }
 0x3e7   : > { %v430_v29 = vld [vmem:[#allocation2 + $0x10] sm:$0xff] }
 0x3e8   : > { %480 = vrot.lane.b32.xlu0 %v430_v29, %s767_s28 }
 0x3ec   : > { %482 = vrot.lane.b32.xlu0 %v431_v30, %s767_s28 }
 0x40b   : > { %433 = vadd.xlane.f32.xlu0 %v432_v32 }
 0x45a   : > { %v481_v33 = vpop.permute.xlu0 %480 }
 0x45b   : > { %v486_v34 = vsel %vm195_vm2, %v481_v33, 0.0 }
 0x45c   : > { %487 = vadd.xlane.f32.xlu1 %v486_v34 }
 0x45e   : > { %v483_v35 = vpop.permute.xlu0 %482 }
 0x45f   : > { %v489_v37 = vsel %vm195_vm2, %v483_v35, 0.0 }
 0x460   : > { %490 = vadd.xlane.f32.xlu1 %v489_v37 }
 0x464   : > { %436 = vadd.xlane.f32.xlu1 %v435_v38 }
 0x498   : > { %v434_v60 = vpop.xlane.xlu0 %433 }
 0x499   : > { %v438_v62 = vmax.f32 %v434_v60, 1e-30 }
 0x4e9   : > { %v488_v39 = vpop.xlane.xlu1 %487 }
 0x4ea   : > { %v492_v40 = vmax.f32 %v488_v39, 1e-30 }
 0x4ec   : > { %715 = vrcp.f32 %v492_v40 }
 0x4ed   : > { %v491_v41 = vpop.xlane.xlu1 %490 }
 0x4ee   : > { %v493_v42 = vmax.f32 %v491_v41, 1e-30 }
 0x4f0   : > { %717 = vrcp.f32 %v493_v42 }
 0x4f1   : > { %v437_v61 = vpop.xlane.xlu1 %436  ;;  %719 = vrcp.f32 %v438_v62 }
 0x4f2   : > { %v439_v63 = vmax.f32 %v437_v61, 1e-30 }
 0x4f4   : > { %721 = vrcp.f32 %v439_v63 }
 0x4f6   : > { %v716_v44 = vpop.eup %715 }
 0x4f7   : > { %v496_v45 = vmul.f32 %v716_v44, %v492_v40 }
 0x4f9   : > { %v498_v47 = vsub.f32 2.0, %v496_v45 }
 0x4fa   : > { %v718_v49 = vpop.eup %717 }
 0x4fb   : > { %v497_v50 = vmul.f32 %v718_v49, %v493_v42  ;;  %v500_v52 = vmul.f32 %v716_v44, %v498_v47  ;;  %v720_v0 = vpop.eup %719 }
 0x4fc   : > { %v442_v5 = vmul.f32 %v720_v0, %v438_v62 }
 0x4fd   : > { %v499_v54 = vsub.f32 2.0, %v497_v50  ;;  %v508_v56 = vrot.slane %v500_v52, %v507_v51 }
 0x4fe   : > { %v722_v2 = vpop.eup %721  ;;  %v444_v8 = vsub.f32 2.0, %v442_v5 }
 0x4ff   : > { %v501_v55 = vmul.f32 %v718_v49, %v499_v54  ;;  %v443_v4 = vmul.f32 %v722_v2, %v439_v63 }
 0x500   : > { %v446_v12 = vmul.f32 %v720_v0, %v444_v8 }
 0x501   : > { %v513_v57 = vrot.slane %v501_v55, %v512_v53  ;;  %v445_v7 = vsub.f32 2.0, %v443_v4 }
 0x502   : > { %v455_v14 = vrot.slane %v446_v12, %v454_v11 }
 0x503   : > { %v515_v58 = vsel %vm514_vm8, %v513_v57, %v508_v56  ;;  %v447_v10 = vmul.f32 %v722_v2, %v445_v7 }
 0x504   : > { %v523_v59 = vmul.f32 %v515_v58, %v430_v29  ;;  %v524_v1 = vmul.f32 %v515_v58, %v431_v30 }
 0x505   : > { %v460_v13 = vrot.slane %v447_v10, %v459_v9 }
 0x506   : > { %528 = vrot.lane.b32.xlu1 %v523_v59, %s767_s28 }
 0x507   : > { %v462_v15 = vsel %vm461_vm9, %v460_v13, %v455_v14 }
 0x508   : > { %v476_v16 = vmul.f32 %v462_v15, %v428_v31  ;;  %v477_v19 = vmul.f32 %v462_v15, %v429_v36 }
 0x50a   : > { %530 = vrot.lane.b32.xlu1 %v524_v1, %s767_s28 }
 0x578   : > { %v529_v17 = vpop.permute.xlu1 %528 }
 0x579   : > { %v534_v18 = vsub.f32 %v476_v16, %v529_v17 }
 0x57b   : > { %v536_v21 = vmul.f32 %v534_v18, %v534_v18 }
 0x57c   : > { %v531_v20 = vpop.permute.xlu1 %530 }
 0x57d   : > { %v535_v22 = vsub.f32 %v477_v19, %v531_v20  ;;  %v538_v24 = vsel %vm195_vm2, %v536_v21, 0.0 }
 0x57f   : > { %v537_v23 = vmul.f32 %v535_v22, %v535_v22 }
 0x581   : > { %v539_v25 = vsel %vm195_vm2, %v537_v23, 0.0 }
 0x582   : > { %v540_v26 = vadd.f32 %v539_v25, %v538_v24 }
 0x584   : > { %541 = vadd.xlane.f32.xlu1 %v540_v26 }
 0x611   : > { %v542_v3 = vpop.xlane.xlu1 %541 }
 0x612   : > { %v543_v27 = vrot.slane %v542_v3, 4 }
 0x614   : > { %v544_v28 = vadd.f32 %v543_v27, %v542_v3 }
 0x616   : > { %v545_v29 = vrot.slane %v544_v28, 2 }
 0x618   : > { %v546_v30 = vadd.f32 %v545_v29, %v544_v28 }
 0x61a   : > { %v547_v31 = vrot.slane %v546_v30, 1 }
 0x61c   : > { %v548_v32 = vadd.f32 %v547_v31, %v546_v30 }
 0x61e   : > { %670 = vpush %v548_v32 }
 0x64f   : > { %s671_s5 = spop %670 }
 0x650   : > { %s551_s6 = smul.f32 %s671_s5, %s550_s4 }
 0x652   : > { %553 = sst [smem:[#allocation4]] %s551_s6 }
 0x653 PF: > { %p680_p6 = scmp.eq.s32.totalorder %s796_s13, 2  ;;  %s723_s9 = scalar_lea.hbm %s896_s2, 16 }
 0x654   : > { %p724_p7 = scmp.ne.s32.totalorder %s896_s2, %s723_s9  ;;  %p729_p10 = scmp.lt.u32.totalorder %s723_s9, %s896_s2 }
 0x656   : > { %p725_p8 = pnand %p724_p7, %p680_p6 }
 0x658   : > { %p726_p9 = pneg %p725_p8 }
 0x65a   : > { %p731_p11 = pnand %p729_p10, %p726_p9 }
 0x65c   : > { %734 = shalt.err (!%p731_p11)
}
 0x65d   : > { %s768_s16 = smov [#allocation4]   ;;  %s735_s21 = scalar_lea.hbm %s897_s3, 16 }
 0x65e   : > { %673 = dma.smem_to_hbm (%p680_p6), %s768_s16, 16, %s896_s2, [#allocation5]  }
 0x65f   : > { %p736_p12 = scmp.ne.s32.totalorder %s897_s3, %s735_s21  ;;  %p741_p1 = scmp.lt.u32.totalorder %s735_s21, %s897_s3 }
 0x661   : > { %p737_p13 = pnand %p736_p12, %p680_p6 }
 0x663   : > { %p738_p0 = pneg %p737_p13 }
 0x665   : > { %p743_p2 = pnand %p741_p1, %p738_p0 }
 0x667   : > { %746 = shalt.err (!%p743_p2)
}
 0x668   : > { %s769_s26 = smov [#allocation6]  }
 0x669   : > { %675 = dma.smem_to_hbm (%p680_p6), %s769_s26, 16, %s897_s3, [#allocation7]  }
 0x66a   : > { %752 = dma.done.wait (%p680_p6), [#allocation5], 16  }
 0x66b   : > { %754 = vsyncadd (%p680_p6), [#allocation5], 4294967280 }
 0x66c   : > { %756 = dma.done.wait (%p680_p6), [#allocation7], 16  }
 0x66d   : > { %758 = vsyncadd (%p680_p6), [#allocation7], 4294967280 }
 0x66e   : > { %583 = sfence }
 0x66f PF: > { %s16_s12 = sadd.s32 1, %s761_s12  }
 0x670   : > { %p13_p3 = scmp.ge.s32.totalorder %s16_s12, 5  }
 0x672   :  { %15 = sbr.rel (!%p13_p3) target bundleno = 2 (0x2), region = 78 }
 0x679   :  { %589 = vsyncpa [#allocation5], 1 }
 0x67a   :  { %591 = vsyncpa [#allocation5 + $0x1], 1 }
 0x67b   :  { %592 = vsyncpa [#allocation7], 1 }

</bundles_post_ra>
